<compile_context>
chip_gen: v6e
topology: v6e:2x2x1
jax: 0.10.0
libtpu: 0.0.40
codegen_flags: <defaults>
</compile_context>

<pallas_src>
import functools

import jax
import jax.numpy as jnp
from jax import lax
from jax.experimental import pallas as pl
from jax.experimental.pallas import tpu as pltpu


def _round_up(v, m):
    return ((v + m - 1) // m) * m


# ----------------------------------------------------------------------------
# Pallas kernel: fused in-VMEM unfold (via lane rolls) + per-tap MXU matmuls
# + bias, fp32 accumulation, lane-dense store.
# ----------------------------------------------------------------------------
def _conv_taps_kernel(x_ref, w_ref, b_ref, o_ref, *, offsets):
    # x_ref: (C, NLp)    flattened, zero-padded input columns (lanes)
    # w_ref: (T, OC, C)  per-tap weight matrices, T = KH*KW
    # b_ref: (OC, 1)     bias
    # o_ref: (OC, NLp)   dense (stride-1) output columns, lane-dense (128x)
    x = x_ref[...]                                   # single VMEM load
    oc, n_cols = o_ref.shape
    width = x_ref.shape[1]
    # Bias folded into the fp32 accumulator init.
    acc = jnp.broadcast_to(b_ref[...], (oc, n_cols)).astype(jnp.float32)
    for t, s in enumerate(offsets):                  # statically unrolled taps
        # Shifted window x[:, p + s]: lane rotation on the XLU (wrapped lanes
        # only land in padding columns that the wrapper discards).
        xs = x if s == 0 else pltpu.roll(x, shift=width - s, axis=1)
        acc = acc + jnp.dot(w_ref[t], xs, preferred_element_type=jnp.float32)
    o_ref[...] = acc.astype(o_ref.dtype)


# ----------------------------------------------------------------------------
# Wrapper: layout plumbing (flatten / pad / crop) around a single pallas_call.
# ----------------------------------------------------------------------------
@functools.partial(jax.jit, static_argnames=("stride", "padding", "dilation"))
def conv2d_forward(x, weight, bias, *, stride=(1, 1), padding=(0, 0),
                   dilation=(1, 1)):
    N, C, H, W = x.shape
    OC, IC, KH, KW = weight.shape
    assert C == IC
    sh, sw = stride
    ph, pw = padding
    dh, dw = dilation

    Hp, Wp = H + 2 * ph, W + 2 * pw
    Hd = Hp - dh * (KH - 1)          # dense (stride-1) valid output rows
    Wd = Wp - dw * (KW - 1)          # dense (stride-1) valid output cols
    Hout = (Hd - 1) // sh + 1
    Wout = (Wd - 1) // sw + 1

    if ph or pw:
        x = jnp.pad(x, ((0, 0), (0, 0), (ph, ph), (pw, pw)))

    # Flatten batch + spatial into one lane-dense column axis: (C, N*Hp*Wp).
    n_cols = N * Hp * Wp
    offsets = tuple(dh * ki * Wp + dw * kj
                    for ki in range(KH) for kj in range(KW))
    nlp = _round_up(n_cols + offsets[-1], 128)       # lane width (128 multiple)
    x_flat = jnp.transpose(x, (1, 0, 2, 3)).reshape(C, n_cols)
    x_flat = jnp.pad(x_flat, ((0, 0), (0, nlp - n_cols)))

    w_taps = jnp.transpose(weight, (2, 3, 0, 1)).reshape(KH * KW, OC, C)
    b_col = bias.reshape(OC, 1)

    kernel = functools.partial(_conv_taps_kernel, offsets=offsets)
    cost = pl.CostEstimate(
        flops=2 * OC * C * KH * KW * nlp,
        transcendentals=0,
        bytes_accessed=4 * (C * nlp + KH * KW * OC * C + OC + OC * nlp))

    out_flat = pl.pallas_call(
        kernel,
        out_shape=jax.ShapeDtypeStruct((OC, nlp), x.dtype),
        grid_spec=pltpu.PrefetchScalarGridSpec(
            num_scalar_prefetch=0,
            grid=(1,),                                  # single step: batch is in lanes
            in_specs=[
                pl.BlockSpec((C, nlp), lambda i: (0, 0)),            # input slab
                pl.BlockSpec((KH * KW, OC, C), lambda i: (0, 0, 0)), # per-tap weights
                pl.BlockSpec((OC, 1), lambda i: (0, 0)),             # bias
            ],
            out_specs=pl.BlockSpec((OC, nlp), lambda i: (0, 0)),     # lane-dense out
        ),
        compiler_params=pltpu.CompilerParams(
            dimension_semantics=("arbitrary",)),
        cost_estimate=cost,
    )(x_flat, w_taps, b_col)

    # Undo the column flattening: keep valid dense positions, apply stride.
    out = out_flat[:, :n_cols].reshape(OC, N, Hp, Wp)
    out = jnp.transpose(out, (1, 0, 2, 3))           # (N, OC, Hp, Wp)
    return out[:, :, :Hd:sh, :Wd:sw]                 # (N, OC, Hout, Wout)


# ----------------------------------------------------------------------------
# Module API (mirrors the PyTorch miniproject classes).
# ----------------------------------------------------------------------------
class Module(object):
    def forward(self, *input):
        raise NotImplementedError

    def backward(self, *gradwrtoutput):
        raise NotImplementedError

    def param(self):
        return []

    def step(self):
        raise NotImplementedError

    def zero_grad(self):
        raise NotImplementedError


class Conv2d(Module):
    def __init__(self, in_channels, out_channels, kernel_size, stride=1,
                 padding=0, dilation=1, *, key=None):
        self.in_channels = in_channels
        self.out_channels = out_channels
        self.kernel_size = kernel_size if isinstance(kernel_size, tuple) else (kernel_size, kernel_size)
        self.stride = stride if isinstance(stride, tuple) else (stride, stride)
        self.padding = padding if isinstance(padding, tuple) else (padding, padding)
        self.dilation = dilation if isinstance(dilation, tuple) else (dilation, dilation)
        a = 3 ** 0.5 * (2 / ((in_channels + out_channels)
                             * self.kernel_size[0] * self.kernel_size[1])) ** 0.5
        if key is None:
            key = jax.random.PRNGKey(0)
        kw, kb = jax.random.split(key)
        self.weight = jax.random.uniform(
            kw, (out_channels, in_channels, *self.kernel_size),
            minval=-a, maxval=a, dtype=jnp.float32)
        self.d_weight = jnp.zeros_like(self.weight)
        self.bias = jax.random.uniform(
            kb, (out_channels,), minval=-a, maxval=a, dtype=jnp.float32)
        self.d_bias = jnp.zeros_like(self.bias)

    def forward(self, input):
        self.input = input
        return conv2d_forward(input, self.weight, self.bias,
                              stride=self.stride, padding=self.padding,
                              dilation=self.dilation)

    def backward(self, gradwrtoutput):
        # TODO(synk): backward not implemented (forward-only Pallas port).
        raise NotImplementedError

    def param(self):
        return [[self.weight, self.d_weight], [self.bias, self.d_bias]]


# ----------------------------------------------------------------------------
# Pure-JAX reference for a correctness sanity check.
# ----------------------------------------------------------------------------
def _ref_conv2d(x, w, b, stride, padding, dilation):
    y = lax.conv_general_dilated(
        x, w, window_strides=stride,
        padding=((padding[0], padding[0]), (padding[1], padding[1])),
        rhs_dilation=dilation,
        dimension_numbers=("NCHW", "OIHW", "NCHW"))
    return y + b[None, :, None, None]


if __name__ == "__main__":
    root = jax.random.PRNGKey(0)
    kx1, kp1, kx2, kp2 = jax.random.split(root, 4)

    # Case 1: miniproject-style defaults (stride=1, padding=0, dilation=1).
    N, C, H, W = 2, 4, 16, 16
    x1 = jax.random.normal(kx1, (N, C, H, W), dtype=jnp.float32)
    conv1 = Conv2d(4, 8, 3, key=kp1)
    out1 = jax.block_until_ready(conv1.forward(x1))
    ref1 = _ref_conv2d(x1, conv1.weight, conv1.bias,
                       conv1.stride, conv1.padding, conv1.dilation)
    assert out1.shape == (N, 8, 14, 14), out1.shape
    assert jnp.allclose(out1, ref1, atol=2e-5, rtol=2e-5), \
        float(jnp.max(jnp.abs(out1 - ref1)))

    # Case 2: exercises the general path (stride=2, padding=1).
    x2 = jax.random.normal(kx2, (2, 3, 9, 11), dtype=jnp.float32)
    conv2 = Conv2d(3, 5, 3, stride=2, padding=1, key=kp2)
    out2 = jax.block_until_ready(conv2.forward(x2))
    ref2 = _ref_conv2d(x2, conv2.weight, conv2.bias,
                       conv2.stride, conv2.padding, conv2.dilation)
    assert out2.shape == (2, 5, 5, 6), out2.shape
    assert jnp.allclose(out2, ref2, atol=2e-5, rtol=2e-5), \
        float(jnp.max(jnp.abs(out2 - ref2)))

    print("KERNEL_OK")
</pallas_src>

<mosaic_0001>
module attributes {stable_mosaic.version = 11 : i64} {
  func.func @_conv_taps_kernel(%arg0: i32, %arg1: memref<4x640xf32, #tpu.memory_space<vmem>>, %arg2: memref<9x8x4xf32, #tpu.memory_space<vmem>>, %arg3: memref<8x1xf32, #tpu.memory_space<vmem>>, %arg4: memref<8x640xf32, #tpu.memory_space<vmem>>) attributes {dimension_semantics = [#tpu.dimension_semantics<arbitrary>], iteration_bounds = array<i64: 1>, scalar_prefetch = 0 : i64, scratch_operands = 0 : i64, tpu.core_type = #tpu.core_type<tc>, window_params = [{pipeline_mode = #tpu.pipeline_mode<synchronous>, transform_indices = @transform_0, window_bounds = array<i64: 4, 640>}, {pipeline_mode = #tpu.pipeline_mode<synchronous>, transform_indices = @transform_1, window_bounds = array<i64: 9, 8, 4>}, {pipeline_mode = #tpu.pipeline_mode<synchronous>, transform_indices = @transform_2, window_bounds = array<i64: 8, 1>}, {pipeline_mode = #tpu.pipeline_mode<synchronous>, transform_indices = @transform_3, window_bounds = array<i64: 8, 640>}]} {
    %c0 = arith.constant 0 : index
    %c0_0 = arith.constant 0 : index
    %0 = vector.load %arg1[%c0, %c0_0] : memref<4x640xf32, #tpu.memory_space<vmem>>, vector<4x640xf32>
    %c0_1 = arith.constant 0 : index
    %c0_2 = arith.constant 0 : index
    %1 = vector.load %arg3[%c0_1, %c0_2] : memref<8x1xf32, #tpu.memory_space<vmem>>, vector<8x1xf32>
    %2 = vector.shape_cast %1 : vector<8x1xf32> to vector<8x1xf32>
    %3 = vector.broadcast %2 : vector<8x1xf32> to vector<8x640xf32>
    %c0_3 = arith.constant 0 : index
    %c0_4 = arith.constant 0 : index
    %c0_5 = arith.constant 0 : index
    %4 = vector.load %arg2[%c0_3, %c0_4, %c0_5] : memref<9x8x4xf32, #tpu.memory_space<vmem>>, vector<1x8x4xf32>
    %5 = vector.shape_cast %4 : vector<1x8x4xf32> to vector<8x4xf32>
    %cst = arith.constant dense<0.000000e+00> : vector<8x640xf32>
    %6 = tpu.matmul %5, %0, %cst {dimension_numbers = #tpu.dot_dimension_numbers<[1], [0], [0], [1], [0, 0, 1, 1], [], []>} : vector<8x4xf32>, vector<4x640xf32>, vector<8x640xf32> -> vector<8x640xf32>
    %7 = arith.addf %3, %6 : vector<8x640xf32>
    %c639_i32 = arith.constant 639 : i32
    %8 = tpu.dynamic_rotate %0 by %c639_i32 dim 1 : vector<4x640xf32>, i32 -> vector<4x640xf32>
    %c1 = arith.constant 1 : index
    %c0_6 = arith.constant 0 : index
    %c0_7 = arith.constant 0 : index
    %9 = vector.load %arg2[%c1, %c0_6, %c0_7] : memref<9x8x4xf32, #tpu.memory_space<vmem>>, vector<1x8x4xf32>
    %10 = vector.shape_cast %9 : vector<1x8x4xf32> to vector<8x4xf32>
    %cst_8 = arith.constant dense<0.000000e+00> : vector<8x640xf32>
    %11 = tpu.matmul %10, %8, %cst_8 {dimension_numbers = #tpu.dot_dimension_numbers<[1], [0], [0], [1], [0, 0, 1, 1], [], []>} : vector<8x4xf32>, vector<4x640xf32>, vector<8x640xf32> -> vector<8x640xf32>
    %12 = arith.addf %7, %11 : vector<8x640xf32>
    %c638_i32 = arith.constant 638 : i32
    %13 = tpu.dynamic_rotate %0 by %c638_i32 dim 1 : vector<4x640xf32>, i32 -> vector<4x640xf32>
    %c2 = arith.constant 2 : index
    %c0_9 = arith.constant 0 : index
    %c0_10 = arith.constant 0 : index
    %14 = vector.load %arg2[%c2, %c0_9, %c0_10] : memref<9x8x4xf32, #tpu.memory_space<vmem>>, vector<1x8x4xf32>
    %15 = vector.shape_cast %14 : vector<1x8x4xf32> to vector<8x4xf32>
    %cst_11 = arith.constant dense<0.000000e+00> : vector<8x640xf32>
    %16 = tpu.matmul %15, %13, %cst_11 {dimension_numbers = #tpu.dot_dimension_numbers<[1], [0], [0], [1], [0, 0, 1, 1], [], []>} : vector<8x4xf32>, vector<4x640xf32>, vector<8x640xf32> -> vector<8x640xf32>
    %17 = arith.addf %12, %16 : vector<8x640xf32>
    %c624_i32 = arith.constant 624 : i32
    %18 = tpu.dynamic_rotate %0 by %c624_i32 dim 1 : vector<4x640xf32>, i32 -> vector<4x640xf32>
    %c3 = arith.constant 3 : index
    %c0_12 = arith.constant 0 : index
    %c0_13 = arith.constant 0 : index
    %19 = vector.load %arg2[%c3, %c0_12, %c0_13] : memref<9x8x4xf32, #tpu.memory_space<vmem>>, vector<1x8x4xf32>
    %20 = vector.shape_cast %19 : vector<1x8x4xf32> to vector<8x4xf32>
    %cst_14 = arith.constant dense<0.000000e+00> : vector<8x640xf32>
    %21 = tpu.matmul %20, %18, %cst_14 {dimension_numbers = #tpu.dot_dimension_numbers<[1], [0], [0], [1], [0, 0, 1, 1], [], []>} : vector<8x4xf32>, vector<4x640xf32>, vector<8x640xf32> -> vector<8x640xf32>
    %22 = arith.addf %17, %21 : vector<8x640xf32>
    %c623_i32 = arith.constant 623 : i32
    %23 = tpu.dynamic_rotate %0 by %c623_i32 dim 1 : vector<4x640xf32>, i32 -> vector<4x640xf32>
    %c4 = arith.constant 4 : index
    %c0_15 = arith.constant 0 : index
    %c0_16 = arith.constant 0 : index
    %24 = vector.load %arg2[%c4, %c0_15, %c0_16] : memref<9x8x4xf32, #tpu.memory_space<vmem>>, vector<1x8x4xf32>
    %25 = vector.shape_cast %24 : vector<1x8x4xf32> to vector<8x4xf32>
    %cst_17 = arith.constant dense<0.000000e+00> : vector<8x640xf32>
    %26 = tpu.matmul %25, %23, %cst_17 {dimension_numbers = #tpu.dot_dimension_numbers<[1], [0], [0], [1], [0, 0, 1, 1], [], []>} : vector<8x4xf32>, vector<4x640xf32>, vector<8x640xf32> -> vector<8x640xf32>
    %27 = arith.addf %22, %26 : vector<8x640xf32>
    %c622_i32 = arith.constant 622 : i32
    %28 = tpu.dynamic_rotate %0 by %c622_i32 dim 1 : vector<4x640xf32>, i32 -> vector<4x640xf32>
    %c5 = arith.constant 5 : index
    %c0_18 = arith.constant 0 : index
    %c0_19 = arith.constant 0 : index
    %29 = vector.load %arg2[%c5, %c0_18, %c0_19] : memref<9x8x4xf32, #tpu.memory_space<vmem>>, vector<1x8x4xf32>
    %30 = vector.shape_cast %29 : vector<1x8x4xf32> to vector<8x4xf32>
    %cst_20 = arith.constant dense<0.000000e+00> : vector<8x640xf32>
    %31 = tpu.matmul %30, %28, %cst_20 {dimension_numbers = #tpu.dot_dimension_numbers<[1], [0], [0], [1], [0, 0, 1, 1], [], []>} : vector<8x4xf32>, vector<4x640xf32>, vector<8x640xf32> -> vector<8x640xf32>
    %32 = arith.addf %27, %31 : vector<8x640xf32>
    %c608_i32 = arith.constant 608 : i32
    %33 = tpu.dynamic_rotate %0 by %c608_i32 dim 1 : vector<4x640xf32>, i32 -> vector<4x640xf32>
    %c6 = arith.constant 6 : index
    %c0_21 = arith.constant 0 : index
    %c0_22 = arith.constant 0 : index
    %34 = vector.load %arg2[%c6, %c0_21, %c0_22] : memref<9x8x4xf32, #tpu.memory_space<vmem>>, vector<1x8x4xf32>
    %35 = vector.shape_cast %34 : vector<1x8x4xf32> to vector<8x4xf32>
    %cst_23 = arith.constant dense<0.000000e+00> : vector<8x640xf32>
    %36 = tpu.matmul %35, %33, %cst_23 {dimension_numbers = #tpu.dot_dimension_numbers<[1], [0], [0], [1], [0, 0, 1, 1], [], []>} : vector<8x4xf32>, vector<4x640xf32>, vector<8x640xf32> -> vector<8x640xf32>
    %37 = arith.addf %32, %36 : vector<8x640xf32>
    %c607_i32 = arith.constant 607 : i32
    %38 = tpu.dynamic_rotate %0 by %c607_i32 dim 1 : vector<4x640xf32>, i32 -> vector<4x640xf32>
    %c7 = arith.constant 7 : index
    %c0_24 = arith.constant 0 : index
    %c0_25 = arith.constant 0 : index
    %39 = vector.load %arg2[%c7, %c0_24, %c0_25] : memref<9x8x4xf32, #tpu.memory_space<vmem>>, vector<1x8x4xf32>
    %40 = vector.shape_cast %39 : vector<1x8x4xf32> to vector<8x4xf32>
    %cst_26 = arith.constant dense<0.000000e+00> : vector<8x640xf32>
    %41 = tpu.matmul %40, %38, %cst_26 {dimension_numbers = #tpu.dot_dimension_numbers<[1], [0], [0], [1], [0, 0, 1, 1], [], []>} : vector<8x4xf32>, vector<4x640xf32>, vector<8x640xf32> -> vector<8x640xf32>
    %42 = arith.addf %37, %41 : vector<8x640xf32>
    %c606_i32 = arith.constant 606 : i32
    %43 = tpu.dynamic_rotate %0 by %c606_i32 dim 1 : vector<4x640xf32>, i32 -> vector<4x640xf32>
    %c8 = arith.constant 8 : index
    %c0_27 = arith.constant 0 : index
    %c0_28 = arith.constant 0 : index
    %44 = vector.load %arg2[%c8, %c0_27, %c0_28] : memref<9x8x4xf32, #tpu.memory_space<vmem>>, vector<1x8x4xf32>
    %45 = vector.shape_cast %44 : vector<1x8x4xf32> to vector<8x4xf32>
    %cst_29 = arith.constant dense<0.000000e+00> : vector<8x640xf32>
    %46 = tpu.matmul %45, %43, %cst_29 {dimension_numbers = #tpu.dot_dimension_numbers<[1], [0], [0], [1], [0, 0, 1, 1], [], []>} : vector<8x4xf32>, vector<4x640xf32>, vector<8x640xf32> -> vector<8x640xf32>
    %47 = arith.addf %42, %46 : vector<8x640xf32>
    %c0_30 = arith.constant 0 : index
    %c0_31 = arith.constant 0 : index
    %48 = vector.load %arg4[%c0_30, %c0_31] : memref<8x640xf32, #tpu.memory_space<vmem>>, vector<8x640xf32>
    tpu.vector_store %arg4[%c0_30, %c0_31], %47 {strides = array<i32>} : memref<8x640xf32, #tpu.memory_space<vmem>>, vector<8x640xf32>,
    return
  }
  func.func @transform_0(%arg0: i32) -> (i32, i32) {
    %c0_i32 = arith.constant 0 : i32
    %c0_i32_0 = arith.constant 0 : i32
    %c0_i32_1 = arith.constant 0 : i32
    return %c0_i32, %c0_i32_0 : i32, i32
  }
  func.func @transform_1(%arg0: i32) -> (i32, i32, i32) {
    %c0_i32 = arith.constant 0 : i32
    %c0_i32_0 = arith.constant 0 : i32
    %c0_i32_1 = arith.constant 0 : i32
    %c0_i32_2 = arith.constant 0 : i32
    return %c0_i32, %c0_i32_0, %c0_i32_1 : i32, i32, i32
  }
  func.func @transform_2(%arg0: i32) -> (i32, i32) {
    %c0_i32 = arith.constant 0 : i32
    %c0_i32_0 = arith.constant 0 : i32
    %c0_i32_1 = arith.constant 0 : i32
    return %c0_i32, %c0_i32_0 : i32, i32
  }
  func.func @transform_3(%arg0: i32) -> (i32, i32) {
    %c0_i32 = arith.constant 0 : i32
    %c0_i32_0 = arith.constant 0 : i32
    %c0_i32_1 = arith.constant 0 : i32
    return %c0_i32, %c0_i32_0 : i32, i32
  }
}

</mosaic_0001>

<bundles_post_ra>
// kernel: conv2d_forward.1
= control target key start
LH: loop header
LB: loop body
LE: loop exit
PB: predicated region body
PF: predicated region fallthrough
CT: control target
= control target key end

     0   :  { %vm33_vm0 = vcmask 1043456   ;;  %v2455_v2 = vmov 0.0   ;;  %s2456_s16 = smov 127   ;;  %vm29_vm1 = vcmask 31744   ;;  %vm2457_vm2 = vmmov 0   ;;  %s2458_s21 = smov 126   ;;  %s2774_s0 = inlined_call_operand.vmem [shape: f32[4,640], index: 0, kind: input, shape index: {}]   ;;  %s2775_s1 = inlined_call_operand.vmem [shape: f32[9,8,4], index: 1, kind: input, shape index: {}]   ;;  %s2776_s2 = inlined_call_operand.vmem [shape: f32[8,1], index: 2, kind: input, shape index: {}]   ;;  %s2777_s3 = inlined_call_operand.vmem [shape: f32[8,640], index: 3, kind: output, shape index: {}]  }
   0x1   :  { %v2489_v0 = vld [vmem:[%s2774_s0 + $0x8] sm:$0xff]  ;;  %v2494_v1 = vld [vmem:[%s2774_s0] sm:$0xff]  ;;  %108 = vmatprep.mubr.f32.mxu0 %v2455_v2  ;;  %179 = vmatprep.mubr.f32.mxu1 %v2455_v2  ;;  %v16_v6 = vld [vmem:[%s2774_s0 + $0x10] sm:$0xf]  ;;  %s2459_s0 = smov 112   ;;  %s2460_s22 = smov 111   ;;  %v273_v9 = vlaneseq }
   0x2   :  { %267 = vrot.lane.b32.xlu0 %v2489_v0, %s2456_s16  ;;  %263 = vrot.lane.b32.xlu1 %v2494_v1, %s2456_s16  ;;  %v2502_v3 = vcombine.high %v2489_v0, %v2489_v0  ;;  %v27_v4 = vcombine.high %v2494_v1, %v2494_v1  ;;  %v23_v5 = vld [vmem:[%s2775_s1] sm:$0xff]  ;;  %s2461_s23 = smov 110   ;;  %s2462_s24 = smov 96   ;;  %v2464_v7 = vmov 0   ;;  %v2306_v17 = vld [vmem:[%s2775_s1 + $0x8] sm:$0xff] }
   0x3   :  { %s2463_s25 = smov 95   ;;  %2452 = vset.pattern.permute.xlu0 %v2464_v7  ;;  %s2465_s26 = smov 94   ;;  %v17_v8 = vld [vmem:[%s2776_s2] sm:$0xff]  ;;  %v2553_v10 = vand.u32 127, %v273_v9  ;;  %v2315_v27 = vld [vmem:[%s2775_s1 + $0x10] sm:$0xff]  ;;  %v2324_v38 = vld [vmem:[%s2775_s1 + $0x18] sm:$0xff] }
   0x4   :  { %2301 = vmatprep.subr.msk.mxu1 %vm33_vm0, %v2502_v3  ;;  %2298 = vmatprep.subr.msk.mxu0 %vm33_vm0, %v27_v4  ;;  %v2333_v49 = vld [vmem:[%s2775_s1 + $0x20] sm:$0xff]  ;;  %v2342_v60 = vld [vmem:[%s2775_s1 + $0x28] sm:$0xff] }
   0x5   :  { %2299 = vmatpush1.msk.msra.mxu0 %vm33_vm0, %v2494_v1  ;;  %2302 = vmatpush1.msk.msra.mxu1 %vm33_vm0, %v2489_v0  ;;  %vm275_vm3 = vcmp.lt.s32.totalorder %v2553_v10, 127  ;;  %vm528_vm4 = vcmp.lt.s32.totalorder %v2553_v10, 126  ;;  %vm781_vm5 = vcmp.lt.s32.totalorder %v2553_v10, 112  ;;  %vm1034_vm6 = vcmp.lt.s32.totalorder %v2553_v10, 111 }
   0x6   :  { %269 = vrot.lane.b32.xlu1 %v2502_v3, %s2456_s16  ;;  %265 = vrot.lane.b32.xlu0 %v27_v4, %s2456_s16  ;;  %vm1287_vm7 = vcmp.lt.s32.totalorder %v2553_v10, 110  ;;  %vm1540_vm8 = vcmp.lt.s32.totalorder %v2553_v10, 96  ;;  %vm1793_vm9 = vcmp.lt.s32.totalorder %v2553_v10, 95  ;;  %vm2046_vm10 = vcmp.lt.s32.totalorder %v2553_v10, 94 }
   0x7   :  { %2300 = vmatmul.mubr.msk.f32.vlgmr.msra.gmra.mxu0 %vm29_vm1, %v23_v5  ;;  %2303 = vmatmul.mubr.msk.f32.vlgmr.msra.gmra.mxu1 %vm29_vm1, %v23_v5 }
   0x8   :  { %2396 = vmatprep.subr.mxu0 %v2455_v2  ;;  %2398 = vmatprep.mubr.msk.f32.mxu0 %vm2457_vm2, %v2455_v2 }
   0x9   :  { %2397 = vmatpush3.msk.msra.mxu0 %vm33_vm0, %v16_v6  ;;  %365 = vmatprep.mubr.f32.mxu1 %v2455_v2 }
   0xa   :  { %520 = vrot.lane.b32.xlu1 %v27_v4, %s2458_s21  ;;  %271 = vrot.lane.b32.xlu0 %v16_v6, %s2456_s16 }
   0xb   :  { %2399 = vmatmul.mubr.msk.f32.vlgmr.msra.gmra.mxu0 %vm29_vm1, %v23_v5 }
   0xc   :  { %436 = vmatprep.mubr.f32.mxu0 %v2455_v2 }
   0xe   :  { %518 = vrot.lane.b32.xlu1 %v2494_v1, %s2458_s21  ;;  %522 = vrot.lane.b32.xlu0 %v2489_v0, %s2458_s21 }
  0x12   :  { %526 = vrot.lane.b32.xlu1 %v16_v6, %s2458_s21  ;;  %524 = vrot.lane.b32.xlu0 %v2502_v3, %s2458_s21 }
  0x16   :  { %775 = vrot.lane.b32.xlu1 %v2489_v0, %s2459_s0  ;;  %773 = vrot.lane.b32.xlu0 %v27_v4, %s2459_s0 }
  0x1a   :  { %777 = vrot.lane.b32.xlu1 %v2502_v3, %s2459_s0  ;;  %771 = vrot.lane.b32.xlu0 %v2494_v1, %s2459_s0 }
  0x1e   :  { %1026 = vrot.lane.b32.xlu1 %v27_v4, %s2460_s22  ;;  %779 = vrot.lane.b32.xlu0 %v16_v6, %s2459_s0 }
  0x22   :  { %1024 = vrot.lane.b32.xlu1 %v2494_v1, %s2460_s22  ;;  %1028 = vrot.lane.b32.xlu0 %v2489_v0, %s2460_s22 }
  0x26   :  { %1032 = vrot.lane.b32.xlu1 %v16_v6, %s2460_s22  ;;  %1030 = vrot.lane.b32.xlu0 %v2502_v3, %s2460_s22 }
  0x2a   :  { %1281 = vrot.lane.b32.xlu1 %v2489_v0, %s2461_s23  ;;  %1279 = vrot.lane.b32.xlu0 %v27_v4, %s2461_s23 }
  0x2e   :  { %1283 = vrot.lane.b32.xlu1 %v2502_v3, %s2461_s23  ;;  %1277 = vrot.lane.b32.xlu0 %v2494_v1, %s2461_s23 }
  0x32   :  { %1532 = vrot.lane.b32.xlu1 %v27_v4, %s2462_s24  ;;  %1285 = vrot.lane.b32.xlu0 %v16_v6, %s2461_s23 }
  0x36   :  { %1530 = vrot.lane.b32.xlu1 %v2494_v1, %s2462_s24  ;;  %1534 = vrot.lane.b32.xlu0 %v2489_v0, %s2462_s24 }
  0x3a   :  { %1538 = vrot.lane.b32.xlu1 %v16_v6, %s2462_s24  ;;  %1536 = vrot.lane.b32.xlu0 %v2502_v3, %s2462_s24 }
  0x3e   :  { %1787 = vrot.lane.b32.xlu1 %v2489_v0, %s2463_s25  ;;  %1785 = vrot.lane.b32.xlu0 %v27_v4, %s2463_s25 }
  0x42   :  { %1789 = vrot.lane.b32.xlu1 %v2502_v3, %s2463_s25  ;;  %1783 = vrot.lane.b32.xlu0 %v2494_v1, %s2463_s25 }
  0x46   :  { %2038 = vrot.lane.b32.xlu1 %v27_v4, %s2465_s26  ;;  %1791 = vrot.lane.b32.xlu0 %v16_v6, %s2463_s25 }
  0x4a   :  { %2036 = vrot.lane.b32.xlu1 %v2494_v1, %s2465_s26  ;;  %2040 = vrot.lane.b32.xlu0 %v2489_v0, %s2465_s26 }
  0x4e   :  { %2044 = vrot.lane.b32.xlu1 %v16_v6, %s2465_s26  ;;  %2042 = vrot.lane.b32.xlu0 %v2502_v3, %s2465_s26 }
  0x52   :  { %20 = vperm.xlu0 %2452, %v17_v8   ;;  %v2351_v8 = vld [vmem:[%s2775_s1 + $0x30] sm:$0xff] }
  0x74   :  { %v268_v11 = vpop.permute.xlu0 %267  ;;  %v264_v12 = vpop.permute.xlu1 %263 }
  0x78   :  { %v270_v13 = vpop.permute.xlu1 %269  ;;  %v266_v14 = vpop.permute.xlu0 %265 }
  0x79   :  { %v278_v15 = vsel %vm275_vm3, %v266_v14, %v268_v11  ;;  %v279_v16 = vsel %vm275_vm3, %v264_v12, %v266_v14  ;;  %v277_v22 = vsel %vm275_vm3, %v268_v11, %v270_v13 }
  0x7a   :  { %2307 = vmatprep.subr.msk.mxu1 %vm33_vm0, %v278_v15 }
  0x7b   :  { %2308 = vmatpush1.msk.msra.mxu1 %vm33_vm0, %v279_v16 }
  0x7c   :  { %v521_v18 = vpop.permute.xlu1 %520  ;;  %v272_v19 = vpop.permute.xlu0 %271  ;;  %2401 = vmatprep.subr.mxu1 %v2455_v2  ;;  %2309 = vmatmul.mubr.msk.f32.vlgmr.msra.gmra.mxu1 %vm29_vm1, %v2306_v17 }
  0x7d   :  { %v276_v20 = vsel %vm275_vm3, %v270_v13, %v272_v19  ;;  %v280_v21 = vsel %vm275_vm3, %v272_v19, %v264_v12  ;;  %2403 = vmatprep.mubr.msk.f32.mxu1 %vm2457_vm2, %v2455_v2 }
  0x7e   :  { %2310 = vmatprep.subr.msk.mxu0 %vm33_vm0, %v276_v20  ;;  %2402 = vmatpush3.msk.msra.mxu1 %vm33_vm0, %v280_v21  ;;  %v2360_v20 = vld [vmem:[%s2775_s1 + $0x38] sm:$0xff] }
  0x7f   :  { %2311 = vmatpush1.msk.msra.mxu0 %vm33_vm0, %v277_v22 }
  0x80   :  { %v519_v23 = vpop.permute.xlu1 %518  ;;  %v523_v24 = vpop.permute.xlu0 %522  ;;  %2312 = vmatmul.mubr.msk.f32.vlgmr.msra.gmra.mxu0 %vm29_vm1, %v2306_v17  ;;  %2404 = vmatmul.mubr.msk.f32.vlgmr.msra.gmra.mxu1 %vm29_vm1, %v2306_v17 }
  0x81   :  { %v532_v25 = vsel %vm528_vm4, %v519_v23, %v521_v18  ;;  %v531_v26 = vsel %vm528_vm4, %v521_v18, %v523_v24  ;;  %618 = vmatprep.mubr.f32.mxu0 %v2455_v2  ;;  %689 = vmatprep.mubr.f32.mxu1 %v2455_v2 }
  0x82   :  { %2316 = vmatprep.subr.msk.mxu0 %vm33_vm0, %v531_v26 }
  0x83   :  { %2317 = vmatpush1.msk.msra.mxu0 %vm33_vm0, %v532_v25 }
  0x84   :  { %v527_v28 = vpop.permute.xlu1 %526  ;;  %v525_v29 = vpop.permute.xlu0 %524  ;;  %2406 = vmatprep.subr.mxu0 %v2455_v2  ;;  %2318 = vmatmul.mubr.msk.f32.vlgmr.msra.gmra.mxu0 %vm29_vm1, %v2315_v27 }
  0x85   :  { %v533_v30 = vsel %vm528_vm4, %v527_v28, %v519_v23  ;;  %v529_v31 = vsel %vm528_vm4, %v525_v29, %v527_v28  ;;  %v530_v32 = vsel %vm528_vm4, %v523_v24, %v525_v29  ;;  %2408 = vmatprep.mubr.msk.f32.mxu0 %vm2457_vm2, %v2455_v2 }
  0x86   :  { %2319 = vmatprep.subr.msk.mxu1 %vm33_vm0, %v529_v31  ;;  %2407 = vmatpush3.msk.msra.mxu0 %vm33_vm0, %v533_v30  ;;  %v2369_v31 = vld [vmem:[%s2775_s1 + $0x40] sm:$0xff] }
  0x87   :  { %2320 = vmatpush1.msk.msra.mxu1 %vm33_vm0, %v530_v32 }
  0x88   :  { %v776_v33 = vpop.permute.xlu1 %775  ;;  %v774_v34 = vpop.permute.xlu0 %773  ;;  %2321 = vmatmul.mubr.msk.f32.vlgmr.msra.gmra.mxu1 %vm29_vm1, %v2315_v27  ;;  %2409 = vmatmul.mubr.msk.f32.vlgmr.msra.gmra.mxu0 %vm29_vm1, %v2315_v27 }
  0x89   :  { %v784_v35 = vsel %vm781_vm5, %v774_v34, %v776_v33  ;;  %871 = vmatprep.mubr.f32.mxu1 %v2455_v2  ;;  %942 = vmatprep.mubr.f32.mxu0 %v2455_v2 }
  0x8a   :  { %2325 = vmatprep.subr.msk.mxu1 %vm33_vm0, %v784_v35 }
  0x8c   :  { %v778_v36 = vpop.permute.xlu1 %777  ;;  %v772_v37 = vpop.permute.xlu0 %771 }
  0x8d   :  { %v785_v39 = vsel %vm781_vm5, %v772_v37, %v774_v34  ;;  %v783_v44 = vsel %vm781_vm5, %v776_v33, %v778_v36 }
  0x8e   :  { %2326 = vmatpush1.msk.msra.mxu1 %vm33_vm0, %v785_v39 }
  0x8f   :  { %2411 = vmatprep.subr.mxu1 %v2455_v2  ;;  %2327 = vmatmul.mubr.msk.f32.vlgmr.msra.gmra.mxu1 %vm29_vm1, %v2324_v38 }
  0x90   :  { %v1027_v40 = vpop.permute.xlu1 %1026  ;;  %v780_v41 = vpop.permute.xlu0 %779  ;;  %2413 = vmatprep.mubr.msk.f32.mxu1 %vm2457_vm2, %v2455_v2 }
  0x91   :  { %v782_v42 = vsel %vm781_vm5, %v778_v36, %v780_v41  ;;  %v786_v43 = vsel %vm781_vm5, %v780_v41, %v772_v37 }
  0x92   :  { %2328 = vmatprep.subr.msk.mxu0 %vm33_vm0, %v782_v42  ;;  %2412 = vmatpush3.msk.msra.mxu1 %vm33_vm0, %v786_v43 }
  0x93   :  { %2329 = vmatpush1.msk.msra.mxu0 %vm33_vm0, %v783_v44  ;;  %2414 = vmatmul.mubr.msk.f32.vlgmr.msra.gmra.mxu1 %vm29_vm1, %v2324_v38 }
  0x94   :  { %v1025_v45 = vpop.permute.xlu1 %1024  ;;  %v1029_v46 = vpop.permute.xlu0 %1028  ;;  %2330 = vmatmul.mubr.msk.f32.vlgmr.msra.gmra.mxu0 %vm29_vm1, %v2324_v38  ;;  %1195 = vmatprep.mubr.f32.mxu1 %v2455_v2 }
  0x95   :  { %v1038_v47 = vsel %vm1034_vm6, %v1025_v45, %v1027_v40  ;;  %v1037_v48 = vsel %vm1034_vm6, %v1027_v40, %v1029_v46  ;;  %1124 = vmatprep.mubr.f32.mxu0 %v2455_v2 }
  0x96   :  { %2334 = vmatprep.subr.msk.mxu0 %vm33_vm0, %v1037_v48 }
  0x97   :  { %2335 = vmatpush1.msk.msra.mxu0 %vm33_vm0, %v1038_v47 }
  0x98   :  { %v1033_v50 = vpop.permute.xlu1 %1032  ;;  %v1031_v51 = vpop.permute.xlu0 %1030  ;;  %2416 = vmatprep.subr.mxu0 %v2455_v2  ;;  %2336 = vmatmul.mubr.msk.f32.vlgmr.msra.gmra.mxu0 %vm29_vm1, %v2333_v49 }
  0x99   :  { %v1039_v52 = vsel %vm1034_vm6, %v1033_v50, %v1025_v45  ;;  %v1035_v53 = vsel %vm1034_vm6, %v1031_v51, %v1033_v50  ;;  %v1036_v54 = vsel %vm1034_vm6, %v1029_v46, %v1031_v51  ;;  %2418 = vmatprep.mubr.msk.f32.mxu0 %vm2457_vm2, %v2455_v2 }
  0x9a   :  { %2337 = vmatprep.subr.msk.mxu1 %vm33_vm0, %v1035_v53  ;;  %2417 = vmatpush3.msk.msra.mxu0 %vm33_vm0, %v1039_v52 }
  0x9b   :  { %2338 = vmatpush1.msk.msra.mxu1 %vm33_vm0, %v1036_v54 }
  0x9c   :  { %v1282_v55 = vpop.permute.xlu1 %1281  ;;  %v1280_v56 = vpop.permute.xlu0 %1279  ;;  %2339 = vmatmul.mubr.msk.f32.vlgmr.msra.gmra.mxu1 %vm29_vm1, %v2333_v49  ;;  %2419 = vmatmul.mubr.msk.f32.vlgmr.msra.gmra.mxu0 %vm29_vm1, %v2333_v49 }
  0x9d   :  { %v1290_v57 = vsel %vm1287_vm7, %v1280_v56, %v1282_v55  ;;  %1377 = vmatprep.mubr.f32.mxu1 %v2455_v2  ;;  %1448 = vmatprep.mubr.f32.mxu0 %v2455_v2 }
  0x9e   :  { %2343 = vmatprep.subr.msk.mxu1 %vm33_vm0, %v1290_v57 }
  0xa0   :  { %v1284_v58 = vpop.permute.xlu1 %1283  ;;  %v1278_v59 = vpop.permute.xlu0 %1277 }
  0xa1   :  { %v1291_v61 = vsel %vm1287_vm7, %v1278_v59, %v1280_v56  ;;  %v1289_v3 = vsel %vm1287_vm7, %v1282_v55, %v1284_v58 }
  0xa2   :  { %2344 = vmatpush1.msk.msra.mxu1 %vm33_vm0, %v1291_v61 }
  0xa3   :  { %2345 = vmatmul.mubr.msk.f32.vlgmr.msra.gmra.mxu1 %vm29_vm1, %v2342_v60  ;;  %2421 = vmatprep.subr.mxu1 %v2455_v2 }
  0xa4   :  { %v1533_v62 = vpop.permute.xlu1 %1532  ;;  %v1286_v63 = vpop.permute.xlu0 %1285  ;;  %2423 = vmatprep.mubr.msk.f32.mxu1 %vm2457_vm2, %v2455_v2 }
  0xa5   :  { %v1288_v0 = vsel %vm1287_vm7, %v1284_v58, %v1286_v63  ;;  %v1292_v1 = vsel %vm1287_vm7, %v1286_v63, %v1278_v59 }
  0xa6   :  { %2346 = vmatprep.subr.msk.mxu0 %vm33_vm0, %v1288_v0  ;;  %2422 = vmatpush3.msk.msra.mxu1 %vm33_vm0, %v1292_v1 }
  0xa7   :  { %2347 = vmatpush1.msk.msra.mxu0 %vm33_vm0, %v1289_v3  ;;  %2424 = vmatmul.mubr.msk.f32.vlgmr.msra.gmra.mxu1 %vm29_vm1, %v2342_v60 }
  0xa8   :  { %v1531_v4 = vpop.permute.xlu1 %1530  ;;  %v1535_v5 = vpop.permute.xlu0 %1534  ;;  %2348 = vmatmul.mubr.msk.f32.vlgmr.msra.gmra.mxu0 %vm29_vm1, %v2342_v60  ;;  %1701 = vmatprep.mubr.f32.mxu1 %v2455_v2 }
  0xa9   :  { %v1544_v6 = vsel %vm1540_vm8, %v1531_v4, %v1533_v62  ;;  %v1543_v7 = vsel %vm1540_vm8, %v1533_v62, %v1535_v5  ;;  %1630 = vmatprep.mubr.f32.mxu0 %v2455_v2 }
  0xaa   :  { %2352 = vmatprep.subr.msk.mxu0 %vm33_vm0, %v1543_v7 }
  0xab   :  { %2353 = vmatpush1.msk.msra.mxu0 %vm33_vm0, %v1544_v6 }
  0xac   :  { %v1539_v9 = vpop.permute.xlu1 %1538  ;;  %v1537_v11 = vpop.permute.xlu0 %1536  ;;  %2354 = vmatmul.mubr.msk.f32.vlgmr.msra.gmra.mxu0 %vm29_vm1, %v2351_v8  ;;  %2426 = vmatprep.subr.mxu0 %v2455_v2 }
  0xad   :  { %v1545_v12 = vsel %vm1540_vm8, %v1539_v9, %v1531_v4  ;;  %v1541_v13 = vsel %vm1540_vm8, %v1537_v11, %v1539_v9  ;;  %v1542_v14 = vsel %vm1540_vm8, %v1535_v5, %v1537_v11  ;;  %2428 = vmatprep.mubr.msk.f32.mxu0 %vm2457_vm2, %v2455_v2 }
  0xae   :  { %2355 = vmatprep.subr.msk.mxu1 %vm33_vm0, %v1541_v13  ;;  %2427 = vmatpush3.msk.msra.mxu0 %vm33_vm0, %v1545_v12 }
  0xaf   :  { %2356 = vmatpush1.msk.msra.mxu1 %vm33_vm0, %v1542_v14 }
  0xb0   :  { %v1788_v15 = vpop.permute.xlu1 %1787  ;;  %2357 = vmatmul.mubr.msk.f32.vlgmr.msra.gmra.mxu1 %vm29_vm1, %v2351_v8  ;;  %v1786_v16 = vpop.permute.xlu0 %1785  ;;  %2429 = vmatmul.mubr.msk.f32.vlgmr.msra.gmra.mxu0 %vm29_vm1, %v2351_v8 }
  0xb1   :  { %v1796_v17 = vsel %vm1793_vm9, %v1786_v16, %v1788_v15  ;;  %1883 = vmatprep.mubr.f32.mxu1 %v2455_v2  ;;  %1954 = vmatprep.mubr.f32.mxu0 %v2455_v2 }
  0xb2   :  { %2361 = vmatprep.subr.msk.mxu1 %vm33_vm0, %v1796_v17 }
  0xb4   :  { %v1790_v18 = vpop.permute.xlu1 %1789  ;;  %v1784_v19 = vpop.permute.xlu0 %1783 }
  0xb5   :  { %v1797_v21 = vsel %vm1793_vm9, %v1784_v19, %v1786_v16  ;;  %v1795_v26 = vsel %vm1793_vm9, %v1788_v15, %v1790_v18 }
  0xb6   :  { %2362 = vmatpush1.msk.msra.mxu1 %vm33_vm0, %v1797_v21 }
  0xb7   :  { %2363 = vmatmul.mubr.msk.f32.vlgmr.msra.gmra.mxu1 %vm29_vm1, %v2360_v20  ;;  %2431 = vmatprep.subr.mxu1 %v2455_v2 }
  0xb8   :  { %v2039_v22 = vpop.permute.xlu1 %2038  ;;  %v1792_v23 = vpop.permute.xlu0 %1791  ;;  %2433 = vmatprep.mubr.msk.f32.mxu1 %vm2457_vm2, %v2455_v2 }
  0xb9   :  { %v1794_v24 = vsel %vm1793_vm9, %v1790_v18, %v1792_v23  ;;  %v1798_v25 = vsel %vm1793_vm9, %v1792_v23, %v1784_v19 }
  0xba   :  { %2364 = vmatprep.subr.msk.mxu0 %vm33_vm0, %v1794_v24  ;;  %2432 = vmatpush3.msk.msra.mxu1 %vm33_vm0, %v1798_v25 }
  0xbb   :  { %2365 = vmatpush1.msk.msra.mxu0 %vm33_vm0, %v1795_v26  ;;  %2434 = vmatmul.mubr.msk.f32.vlgmr.msra.gmra.mxu1 %vm29_vm1, %v2360_v20 }
  0xbc   :  { %v2037_v27 = vpop.permute.xlu1 %2036  ;;  %v2041_v28 = vpop.permute.xlu0 %2040  ;;  %2366 = vmatmul.mubr.msk.f32.vlgmr.msra.gmra.mxu0 %vm29_vm1, %v2360_v20  ;;  %2207 = vmatprep.mubr.f32.mxu1 %v2455_v2 }
  0xbd   :  { %v2050_v29 = vsel %vm2046_vm10, %v2037_v27, %v2039_v22  ;;  %v2049_v30 = vsel %vm2046_vm10, %v2039_v22, %v2041_v28  ;;  %2136 = vmatprep.mubr.f32.mxu0 %v2455_v2 }
  0xbe   :  { %2370 = vmatprep.subr.msk.mxu0 %vm33_vm0, %v2049_v30 }
  0xbf   :  { %2371 = vmatpush1.msk.msra.mxu0 %vm33_vm0, %v2050_v29 }
  0xc0   :  { %v2045_v32 = vpop.permute.xlu1 %2044  ;;  %v2043_v33 = vpop.permute.xlu0 %2042  ;;  %2372 = vmatmul.mubr.msk.f32.vlgmr.msra.gmra.mxu0 %vm29_vm1, %v2369_v31  ;;  %2436 = vmatprep.subr.mxu0 %v2455_v2 }
  0xc1   :  { %v2051_v34 = vsel %vm2046_vm10, %v2045_v32, %v2037_v27  ;;  %v2047_v35 = vsel %vm2046_vm10, %v2043_v33, %v2045_v32  ;;  %v2048_v36 = vsel %vm2046_vm10, %v2041_v28, %v2043_v33  ;;  %2438 = vmatprep.mubr.msk.f32.mxu0 %vm2457_vm2, %v2455_v2 }
  0xc2   :  { %2373 = vmatprep.subr.msk.mxu1 %vm33_vm0, %v2047_v35  ;;  %2437 = vmatpush3.msk.msra.mxu0 %vm33_vm0, %v2051_v34 }
  0xc3   :  { %2374 = vmatpush1.msk.msra.mxu1 %vm33_vm0, %v2048_v36 }
  0xc4   :  { %2375 = vmatmul.mubr.msk.f32.vlgmr.msra.gmra.mxu1 %vm29_vm1, %v2369_v31  ;;  %2439 = vmatmul.mubr.msk.f32.vlgmr.msra.gmra.mxu0 %vm29_vm1, %v2369_v31 }
  0xc7   :  { %v110_v37 = vpop.f32.mrf.mxu0  ;;  %v181_v41 = vpop.f32.mrf.mxu1 }
  0xc9   :  { %v112_v38 = vpop.f32.mrf.mxu0  ;;  %v183_v10 = vpop.f32.mrf.mxu1 }
  0xcb   :  { %v252_v39 = vpop.f32.mrf.mxu0 }
  0xcd   :  { %v2400_v40 = vpop.f32.mrf.mxu0  ;;  %v21_v4 = vpop.permute.xlu0 %20 }
  0xce   :  { %v256_v7 = vadd.f32 %v110_v37, %v21_v4  ;;  %v257_v11 = vadd.f32 %v112_v38, %v21_v4  ;;  %v258_v13 = vadd.f32 %v181_v41, %v21_v4  ;;  %v260_v14 = vadd.f32 %v252_v39, %v21_v4 }
  0xcf   :  { %v259_v18 = vadd.f32 %v183_v10, %v21_v4 }
 0x13c   :  { %v367_v42 = vpop.f32.mrf.mxu1 }
 0x13d   :  { %v513_v15 = vadd.f32 %v367_v42, %v256_v7 }
 0x13e   :  { %v369_v43 = vpop.f32.mrf.mxu1 }
 0x13f   :  { %v514_v17 = vadd.f32 %v369_v43, %v257_v11 }
 0x140   :  { %v438_v44 = vpop.f32.mrf.mxu0  ;;  %v509_v2 = vpop.f32.mrf.mxu1 }
 0x141   :  { %v515_v20 = vadd.f32 %v438_v44, %v258_v13  ;;  %v517_v21 = vadd.f32 %v509_v2, %v260_v14 }
 0x142   :  { %v440_v45 = vpop.f32.mrf.mxu0  ;;  %v2405_v46 = vpop.f32.mrf.mxu1 }
 0x143   :  { %v516_v26 = vadd.f32 %v440_v45, %v259_v18 }
 0x144   :  { %v620_v47 = vpop.f32.mrf.mxu0 }
 0x145   :  { %v766_v22 = vadd.f32 %v620_v47, %v513_v15 }
 0x146   :  { %v622_v48 = vpop.f32.mrf.mxu0 }
 0x147   :  { %v767_v25 = vadd.f32 %v622_v48, %v514_v17 }
 0x148   :  { %v691_v49 = vpop.f32.mrf.mxu1  ;;  %v762_v50 = vpop.f32.mrf.mxu0 }
 0x149   :  { %v768_v27 = vadd.f32 %v691_v49, %v515_v20  ;;  %v770_v28 = vadd.f32 %v762_v50, %v517_v21 }
 0x14a   :  { %v2410_v51 = vpop.f32.mrf.mxu0  ;;  %v693_v52 = vpop.f32.mrf.mxu1 }
 0x14b   :  { %v769_v33 = vadd.f32 %v693_v52, %v516_v26 }
 0x14f   :  { %v873_v53 = vpop.f32.mrf.mxu1 }
 0x150   :  { %v1019_v29 = vadd.f32 %v873_v53, %v766_v22 }
 0x151   :  { %v875_v54 = vpop.f32.mrf.mxu1 }
 0x152   :  { %v1020_v31 = vadd.f32 %v875_v54, %v767_v25 }
 0x153   :  { %v1015_v55 = vpop.f32.mrf.mxu1 }
 0x154   :  { %v944_v56 = vpop.f32.mrf.mxu0  ;;  %v1023_v35 = vadd.f32 %v1015_v55, %v770_v28 }
 0x155   :  { %v2415_v57 = vpop.f32.mrf.mxu1  ;;  %v1021_v34 = vadd.f32 %v944_v56, %v768_v27 }
 0x156   :  { %v946_v58 = vpop.f32.mrf.mxu0 }
 0x157   :  { %v1022_v41 = vadd.f32 %v946_v58, %v769_v33 }
 0x158   :  { %v1126_v59 = vpop.f32.mrf.mxu0 }
 0x159   :  { %v1272_v36 = vadd.f32 %v1126_v59, %v1019_v29 }
 0x15a   :  { %v1128_v60 = vpop.f32.mrf.mxu0 }
 0x15b   :  { %v1273_v38 = vadd.f32 %v1128_v60, %v1020_v31 }
 0x15c   :  { %v1268_v61 = vpop.f32.mrf.mxu0  ;;  %v1197_v62 = vpop.f32.mrf.mxu1 }
 0x15d   :  { %v1274_v42 = vadd.f32 %v1197_v62, %v1021_v34  ;;  %v1276_v43 = vadd.f32 %v1268_v61, %v1023_v35 }
 0x15e   :  { %v2420_v63 = vpop.f32.mrf.mxu0  ;;  %v1199_v0 = vpop.f32.mrf.mxu1 }
 0x15f   :  { %v1275_v46 = vadd.f32 %v1199_v0, %v1022_v41 }
 0x163   :  { %v1379_v1 = vpop.f32.mrf.mxu1 }
 0x164   :  { %v1525_v39 = vadd.f32 %v1379_v1, %v1272_v36 }
 0x165   :  { %v1381_v3 = vpop.f32.mrf.mxu1 }
 0x166   :  { %v1526_v44 = vadd.f32 %v1381_v3, %v1273_v38 }
 0x167   :  { %v1521_v5 = vpop.f32.mrf.mxu1 }
 0x168   :  { %v1450_v6 = vpop.f32.mrf.mxu0  ;;  %v1529_v48 = vadd.f32 %v1521_v5, %v1276_v43 }
 0x169   :  { %v2425_v8 = vpop.f32.mrf.mxu1  ;;  %v1527_v49 = vadd.f32 %v1450_v6, %v1274_v42 }
 0x16a   :  { %v1452_v9 = vpop.f32.mrf.mxu0 }
 0x16b   :  { %v1528_v52 = vadd.f32 %v1452_v9, %v1275_v46 }
 0x16c   :  { %v1632_v12 = vpop.f32.mrf.mxu0 }
 0x16d   :  { %v1778_v2 = vadd.f32 %v1632_v12, %v1525_v39 }
 0x16e   :  { %v1634_v16 = vpop.f32.mrf.mxu0 }
 0x16f   :  { %v1779_v50 = vadd.f32 %v1634_v16, %v1526_v44 }
 0x170   :  { %v1774_v19 = vpop.f32.mrf.mxu0  ;;  %v1703_v23 = vpop.f32.mrf.mxu1 }
 0x171   :  { %v1780_v54 = vadd.f32 %v1703_v23, %v1527_v49  ;;  %v1782_v55 = vadd.f32 %v1774_v19, %v1529_v48 }
 0x172   :  { %v2430_v24 = vpop.f32.mrf.mxu0  ;;  %v1705_v30 = vpop.f32.mrf.mxu1 }
 0x173   :  { %v1781_v58 = vadd.f32 %v1705_v30, %v1528_v52 }
 0x177   :  { %v1885_v32 = vpop.f32.mrf.mxu1 }
 0x178   :  { %v2031_v51 = vadd.f32 %v1885_v32, %v1778_v2 }
 0x179   :  { %v1887_v37 = vpop.f32.mrf.mxu1 }
 0x17a   :  { %v2032_v56 = vadd.f32 %v1887_v37, %v1779_v50 }
 0x17b   :  { %v2027_v40 = vpop.f32.mrf.mxu1 }
 0x17c   :  { %v1956_v10 = vpop.f32.mrf.mxu0  ;;  %v2035_v60 = vadd.f32 %v2027_v40, %v1782_v55 }
 0x17d   :  { %v2435_v45 = vpop.f32.mrf.mxu1  ;;  %v2033_v62 = vadd.f32 %v1956_v10, %v1780_v54 }
 0x17e   :  { %v1958_v47 = vpop.f32.mrf.mxu0 }
 0x17f   :  { %v2034_v1 = vadd.f32 %v1958_v47, %v1781_v58 }
 0x180   :  { %v2138_v53 = vpop.f32.mrf.mxu0 }
 0x181   :  { %v2284_v57 = vadd.f32 %v2138_v53, %v2031_v51 }
 0x182   :  { %v2140_v59 = vpop.f32.mrf.mxu0 }
 0x183   :  { %2289 = vst [vmem:[%s2777_s3] sm:$0xff] %v2284_v57  ;;  %v2285_v61 = vadd.f32 %v2140_v59, %v2032_v56 }
 0x184   :  { %v2209_v63 = vpop.f32.mrf.mxu1  ;;  %v2280_v0 = vpop.f32.mrf.mxu0 }
 0x185   :  { %2290 = vst [vmem:[%s2777_s3 + $0x8] sm:$0xff] %v2285_v61  ;;  %v2286_v3 = vadd.f32 %v2209_v63, %v2033_v62  ;;  %v2288_v4 = vadd.f32 %v2280_v0, %v2035_v60 }
 0x186   :  { %v2211_v5 = vpop.f32.mrf.mxu1  ;;  %v2440_v6 = vpop.f32.mrf.mxu0 }
 0x187   :  { %2291 = vst [vmem:[%s2777_s3 + $0x10] sm:$0xff] %v2286_v3  ;;  %2293 = vst [vmem:[%s2777_s3 + $0x20] sm:$0xff] %v2288_v4  ;;  %v2287_v7 = vadd.f32 %v2211_v5, %v2034_v1 }
 0x189   :  { %2292 = vst [vmem:[%s2777_s3 + $0x18] sm:$0xff] %v2287_v7 }

</bundles_post_ra>
